<compile_context>
chip_gen: v6e
topology: v6e:2x2x1
jax: 0.10.0
libtpu: 0.0.40
codegen_flags: <defaults>
</compile_context>

<pallas_src>
import functools

import jax
import jax.numpy as jnp
from jax import lax
from jax.experimental import pallas as pl
from jax.experimental.pallas import tpu as pltpu


def _contrastive_loss_kernel(x_ref, y_ref, w_ref, out_ref, *, margin):
    # x_ref, y_ref: (TB, D_pad) VMEM blocks (native dtype)
    # w_ref:        (TB, 2) f32  -- [:, 0] = label, [:, 1] = (1 - label), both
    #                              zeroed on padded rows
    # out_ref:      (1, 1, 1) f32 resident per-core partial sum
    i = pl.program_id(1)

    @pl.when(i == 0)
    def _():
        out_ref[...] = jnp.zeros_like(out_ref)

    x = x_ref[...].astype(jnp.float32)
    y = y_ref[...].astype(jnp.float32)

    # Row-wise cosine similarity with PyTorch eps semantics:
    #   cos = <x,y> / (max(||x||, eps) * max(||y||, eps)),  eps = 1e-8
    w12 = jnp.sum(x * y, axis=1, keepdims=True)        # (TB, 1)
    w11 = jnp.sum(x * x, axis=1, keepdims=True)        # (TB, 1)
    w22 = jnp.sum(y * y, axis=1, keepdims=True)        # (TB, 1)

    inv_eps = jnp.float32(1e8)                          # = 1 / eps
    inv = (jnp.minimum(lax.rsqrt(w11), inv_eps) *
           jnp.minimum(lax.rsqrt(w22), inv_eps))        # 1/(max(nx,eps)*max(ny,eps))
    dist = jnp.float32(1.0) - w12 * inv                 # 1 - cos
    pos = dist * dist
    neg = jnp.maximum(jnp.float32(margin) - dist, jnp.float32(0.0))
    neg = neg * neg

    w = w_ref[...]                                      # (TB, 2)
    per_row = w[:, 0:1] * pos + w[:, 1:2] * neg         # 0 on padded rows

    out_ref[...] += jnp.sum(per_row, axis=(0, 1), keepdims=True).reshape(1, 1, 1)


def _vmem_limit_bytes():
    # Physical VMEM: 64 MiB (v7x) / 128 MiB (v5e, v6e).  Leave ~25% headroom
    # for compiler-internal scratch, and never request more than 96 MiB.
    cap = 64 * 1024 * 1024  # conservative v7x floor if the query fails
    try:
        info = pltpu.get_tpu_info()
        cap = int(getattr(info, "vmem_capacity_bytes", cap))
    except Exception:
        pass
    return min((cap * 3) // 4, 96 * 1024 * 1024)


def _choose_tb(b, d_pad, itemsize, block_budget_bytes):
    # Bytes of VMEM live per batch row while a block is in flight:
    #   inputs : 2 arrays x 2 pipeline buffers x d_pad x itemsize  (native dtype)
    #   temps  : ~4 live (TB, d_pad) f32 intermediates (upcasts / products)
    #   weights: (TB, 2) f32 lane-pads to (TB, 128) -> 512 B/row x 2 buffers
    per_row = 2 * 2 * d_pad * itemsize + 4 * d_pad * 4 + 2 * 512
    tb = block_budget_bytes // per_row
    tb = max(8, (tb // 8) * 8)
    b_rounded = ((b + 7) // 8) * 8
    return min(tb, b_rounded)


def contrastive_loss(output1, output2, label, margin=2.0, max_rows_per_block=None):
    """output1, output2: (B, D); label: (B,) or (B, 1). Returns scalar f32 loss."""
    assert output1.shape == output2.shape and output1.ndim == 2
    b, d = output1.shape

    d_pad = max(128, ((d + 127) // 128) * 128)          # lane-dense feature dim
    itemsize = jnp.dtype(output1.dtype).itemsize

    vmem_limit = _vmem_limit_bytes()
    block_budget = (vmem_limit * 3) // 4                # headroom inside the limit
    tb = _choose_tb(b, d_pad, itemsize, block_budget)
    if max_rows_per_block is not None:                  # test hook / manual override
        tb = min(tb, max(8, (int(max_rows_per_block) // 8) * 8))

    n_blocks = -(-b // tb)                              # ceil
    nc = 2 if n_blocks >= 2 else 1                      # megacore split (v7x)
    steps = -(-n_blocks // nc)
    b_pad = nc * steps * tb

    x = output1
    y = output2
    if (b_pad, d_pad) != (b, d):
        x = jnp.pad(x, ((0, b_pad - b), (0, d_pad - d)))
        y = jnp.pad(y, ((0, b_pad - b), (0, d_pad - d)))

    lbl = jnp.reshape(label, (b,)).astype(jnp.float32)
    w_pos = jnp.pad(lbl, (0, b_pad - b))                # label,     0 on pad rows
    w_neg = jnp.pad(jnp.float32(1.0) - lbl, (0, b_pad - b))  # 1-label, 0 on pad rows
    w = jnp.stack([w_pos, w_neg], axis=1)               # (b_pad, 2) f32

    kernel = functools.partial(_contrastive_loss_kernel, margin=float(margin))

    partials = pl.pallas_call(
        kernel,
        out_shape=jax.ShapeDtypeStruct((nc, 1, 1), jnp.float32),
        grid=(nc, steps),
        in_specs=[
            pl.BlockSpec((tb, d_pad), lambda c, i: (c * steps + i, 0)),
            pl.BlockSpec((tb, d_pad), lambda c, i: (c * steps + i, 0)),
            pl.BlockSpec((tb, 2), lambda c, i: (c * steps + i, 0)),
        ],
        out_specs=pl.BlockSpec((1, 1, 1), lambda c, i: (c, 0, 0)),
        compiler_params=pltpu.CompilerParams(
            dimension_semantics=("parallel", "arbitrary"),
            vmem_limit_bytes=vmem_limit,
        ),
    )(x, y, w)

    # Per-core partial sums -> mean over the true batch (done outside the
    # kernel so the hot loop carries no divide / finalize step).
    return jnp.sum(partials) / jnp.float32(b)


def _reference(output1, output2, label, margin=2.0):
    x = output1.astype(jnp.float32)
    y = output2.astype(jnp.float32)
    lbl = jnp.reshape(label, (-1,)).astype(jnp.float32)
    eps = 1e-8
    w12 = jnp.sum(x * y, axis=1)
    nx = jnp.maximum(jnp.sqrt(jnp.sum(x * x, axis=1)), eps)
    ny = jnp.maximum(jnp.sqrt(jnp.sum(y * y, axis=1)), eps)
    cos = w12 / (nx * ny)
    dist = 1.0 - cos
    return jnp.mean(lbl * dist**2 + (1.0 - lbl) * jnp.maximum(margin - dist, 0.0) ** 2)


if __name__ == "__main__":
    key = jax.random.PRNGKey(0)

    # Case 1: small, aligned-ish shapes (as implied by the module).
    k1, k2, k3 = jax.random.split(key, 3)
    B, D = 8, 32
    o1 = jax.random.normal(k1, (B, D), dtype=jnp.float32)
    o2 = jax.random.normal(k2, (B, D), dtype=jnp.float32)
    lab = jax.random.bernoulli(k3, p=0.5, shape=(B,)).astype(jnp.float32)

    loss = jax.block_until_ready(contrastive_loss(o1, o2, lab, margin=2.0))
    ref = _reference(o1, o2, lab, margin=2.0)
    assert jnp.allclose(loss, ref, rtol=1e-5, atol=1e-5), (loss, ref)

    # Case 2: padded tail rows and a non-128 feature dim.
    k4, k5, k6 = jax.random.split(jax.random.PRNGKey(1), 3)
    B2, D2 = 13, 200
    p1 = jax.random.normal(k4, (B2, D2), dtype=jnp.float32)
    p2 = jax.random.normal(k5, (B2, D2), dtype=jnp.float32)
    lab2 = jax.random.bernoulli(k6, p=0.5, shape=(B2,)).astype(jnp.float32)

    loss2 = jax.block_until_ready(contrastive_loss(p1, p2, lab2, margin=2.0))
    ref2 = _reference(p1, p2, lab2, margin=2.0)
    assert jnp.allclose(loss2, ref2, rtol=1e-5, atol=1e-5), (loss2, ref2)

    # Case 3: forces multiple batch blocks -> exercises the 2-way "parallel"
    # core split, multi-step accumulation, and the padded final block.
    k7, k8, k9 = jax.random.split(jax.random.PRNGKey(2), 3)
    B3, D3 = 70, 96
    q1 = jax.random.normal(k7, (B3, D3), dtype=jnp.float32)
    q2 = jax.random.normal(k8, (B3, D3), dtype=jnp.float32)
    lab3 = jax.random.bernoulli(k9, p=0.5, shape=(B3,)).astype(jnp.float32)

    loss3 = jax.block_until_ready(
        contrastive_loss(q1, q2, lab3, margin=1.5, max_rows_per_block=16))
    ref3 = _reference(q1, q2, lab3, margin=1.5)
    assert jnp.allclose(loss3, ref3, rtol=1e-5, atol=1e-5), (loss3, ref3)

    # Case 4: bf16 inputs exercise the native-dtype DMA + in-register upcast.
    k10, k11, k12 = jax.random.split(jax.random.PRNGKey(3), 3)
    B4, D4 = 24, 64
    r1 = jax.random.normal(k10, (B4, D4), dtype=jnp.bfloat16)
    r2 = jax.random.normal(k11, (B4, D4), dtype=jnp.bfloat16)
    lab4 = jax.random.bernoulli(k12, p=0.5, shape=(B4,)).astype(jnp.float32)

    loss4 = jax.block_until_ready(contrastive_loss(r1, r2, lab4, margin=2.0))
    ref4 = _reference(r1, r2, lab4, margin=2.0)
    assert jnp.allclose(loss4, ref4, rtol=1e-4, atol=1e-4), (loss4, ref4)

    print("KERNEL_OK")
</pallas_src>

<mosaic_0001>
module attributes {stable_mosaic.version = 11 : i64} {
  func.func @_contrastive_loss_kernel(%arg0: i32, %arg1: i32, %arg2: memref<8x128xf32, #tpu.memory_space<vmem>>, %arg3: memref<8x128xf32, #tpu.memory_space<vmem>>, %arg4: memref<8x2xf32, #tpu.memory_space<vmem>>, %arg5: memref<1x1x1xf32, #tpu.memory_space<vmem>>) attributes {dimension_semantics = [#tpu.dimension_semantics<parallel>, #tpu.dimension_semantics<arbitrary>], iteration_bounds = array<i64: 1, 1>, scalar_prefetch = 0 : i64, scratch_operands = 0 : i64, tpu.core_type = #tpu.core_type<tc>, window_params = [{transform_indices = @transform_0, window_bounds = array<i64: 8, 128>}, {transform_indices = @transform_1, window_bounds = array<i64: 8, 128>}, {transform_indices = @transform_2, window_bounds = array<i64: 8, 2>}, {transform_indices = @transform_3, window_bounds = array<i64: 1, 1, 1>}]} {
    %c0_i32 = arith.constant 0 : i32
    %0 = arith.cmpi eq, %arg1, %c0_i32 : i32
    %1 = arith.extui %0 : i1 to i32
    %c0_i32_0 = arith.constant 0 : i32
    %2 = arith.cmpi ne, %1, %c0_i32_0 : i32
    scf.if %2 {
      %cst_20 = arith.constant 0.000000e+00 : f32
      %45 = vector.broadcast %cst_20 : f32 to vector<1x1x1xf32>
      %c0_21 = arith.constant 0 : index
      %c0_22 = arith.constant 0 : index
      %c0_23 = arith.constant 0 : index
      %46 = vector.load %arg5[%c0_21, %c0_22, %c0_23] : memref<1x1x1xf32, #tpu.memory_space<vmem>>, vector<1x1x1xf32>
      tpu.vector_store %arg5[%c0_21, %c0_22, %c0_23], %45 {strides = array<i32>} : memref<1x1x1xf32, #tpu.memory_space<vmem>>, vector<1x1x1xf32>,
    } else {
    }
    %c0 = arith.constant 0 : index
    %c0_1 = arith.constant 0 : index
    %3 = vector.load %arg2[%c0, %c0_1] : memref<8x128xf32, #tpu.memory_space<vmem>>, vector<8x128xf32>
    %c0_2 = arith.constant 0 : index
    %c0_3 = arith.constant 0 : index
    %4 = vector.load %arg3[%c0_2, %c0_3] : memref<8x128xf32, #tpu.memory_space<vmem>>, vector<8x128xf32>
    %5 = arith.mulf %3, %4 : vector<8x128xf32>
    %cst = arith.constant dense<0.000000e+00> : vector<8xf32>
    %6 = vector.multi_reduction <add>, %5, %cst [1] : vector<8x128xf32> to vector<8xf32>
    %7 = vector.shape_cast %6 : vector<8xf32> to vector<8x1xf32>
    %8 = arith.mulf %3, %3 : vector<8x128xf32>
    %cst_4 = arith.constant dense<0.000000e+00> : vector<8xf32>
    %9 = vector.multi_reduction <add>, %8, %cst_4 [1] : vector<8x128xf32> to vector<8xf32>
    %10 = vector.shape_cast %9 : vector<8xf32> to vector<8x1xf32>
    %11 = arith.mulf %4, %4 : vector<8x128xf32>
    %cst_5 = arith.constant dense<0.000000e+00> : vector<8xf32>
    %12 = vector.multi_reduction <add>, %11, %cst_5 [1] : vector<8x128xf32> to vector<8xf32>
    %13 = vector.shape_cast %12 : vector<8xf32> to vector<8x1xf32>
    %14 = math.rsqrt %10 : vector<8x1xf32>
    %cst_6 = arith.constant 1.000000e+08 : f32
    %15 = vector.broadcast %cst_6 : f32 to vector<8x1xf32>
    %16 = arith.minimumf %14, %15 : vector<8x1xf32>
    %17 = math.rsqrt %13 : vector<8x1xf32>
    %cst_7 = arith.constant 1.000000e+08 : f32
    %18 = vector.broadcast %cst_7 : f32 to vector<8x1xf32>
    %19 = arith.minimumf %17, %18 : vector<8x1xf32>
    %20 = arith.mulf %16, %19 : vector<8x1xf32>
    %21 = arith.mulf %7, %20 : vector<8x1xf32>
    %cst_8 = arith.constant 1.000000e+00 : f32
    %22 = vector.broadcast %cst_8 : f32 to vector<8x1xf32>
    %23 = arith.subf %22, %21 : vector<8x1xf32>
    %24 = arith.mulf %23, %23 : vector<8x1xf32>
    %cst_9 = arith.constant 2.000000e+00 : f32
    %25 = vector.broadcast %cst_9 : f32 to vector<8x1xf32>
    %26 = arith.subf %25, %23 : vector<8x1xf32>
    %cst_10 = arith.constant 0.000000e+00 : f32
    %27 = vector.broadcast %cst_10 : f32 to vector<8x1xf32>
    %28 = arith.maximumf %26, %27 : vector<8x1xf32>
    %29 = arith.mulf %28, %28 : vector<8x1xf32>
    %c0_11 = arith.constant 0 : index
    %c0_12 = arith.constant 0 : index
    %30 = vector.load %arg4[%c0_11, %c0_12] : memref<8x2xf32, #tpu.memory_space<vmem>>, vector<8x2xf32>
    %31 = vector.extract_strided_slice %30 {offsets = [0, 0], sizes = [8, 1], strides = [1, 1]} : vector<8x2xf32> to vector<8x1xf32>
    %32 = arith.mulf %31, %24 : vector<8x1xf32>
    %33 = vector.extract_strided_slice %30 {offsets = [0, 1], sizes = [8, 1], strides = [1, 1]} : vector<8x2xf32> to vector<8x1xf32>
    %34 = arith.mulf %33, %29 : vector<8x1xf32>
    %35 = arith.addf %32, %34 : vector<8x1xf32>
    %c0_13 = arith.constant 0 : index
    %c0_14 = arith.constant 0 : index
    %c0_15 = arith.constant 0 : index
    %36 = vector.load %arg5[%c0_13, %c0_14, %c0_15] : memref<1x1x1xf32, #tpu.memory_space<vmem>>, vector<1x1x1xf32>
    %37 = vector.shape_cast %35 : vector<8x1xf32> to vector<1x8x1xf32>
    %cst_16 = arith.constant dense<0.000000e+00> : vector<1xf32>
    %38 = vector.multi_reduction <add>, %37, %cst_16 [1, 2] : vector<1x8x1xf32> to vector<1xf32>
    %39 = vector.shape_cast %38 : vector<1xf32> to vector<1x1x1xf32>
    %40 = vector.extract %39[0, 0, 0] : f32 from vector<1x1x1xf32>
    %41 = vector.broadcast %40 : f32 to vector<1x1xf32>
    %42 = vector.shape_cast %41 : vector<1x1xf32> to vector<1x1x1xf32>
    %43 = arith.addf %36, %42 : vector<1x1x1xf32>
    %c0_17 = arith.constant 0 : index
    %c0_18 = arith.constant 0 : index
    %c0_19 = arith.constant 0 : index
    %44 = vector.load %arg5[%c0_17, %c0_18, %c0_19] : memref<1x1x1xf32, #tpu.memory_space<vmem>>, vector<1x1x1xf32>
    tpu.vector_store %arg5[%c0_17, %c0_18, %c0_19], %43 {strides = array<i32>} : memref<1x1x1xf32, #tpu.memory_space<vmem>>, vector<1x1x1xf32>,
    return
  }
  func.func @transform_0(%arg0: i32, %arg1: i32) -> (i32, i32) {
    %c1_i32 = arith.constant 1 : i32
    %0 = arith.muli %arg0, %c1_i32 : i32
    %1 = arith.addi %0, %arg1 : i32
    %c0_i32 = arith.constant 0 : i32
    %c0_i32_0 = arith.constant 0 : i32
    return %1, %c0_i32 : i32, i32
  }
  func.func @transform_1(%arg0: i32, %arg1: i32) -> (i32, i32) {
    %c1_i32 = arith.constant 1 : i32
    %0 = arith.muli %arg0, %c1_i32 : i32
    %1 = arith.addi %0, %arg1 : i32
    %c0_i32 = arith.constant 0 : i32
    %c0_i32_0 = arith.constant 0 : i32
    return %1, %c0_i32 : i32, i32
  }
  func.func @transform_2(%arg0: i32, %arg1: i32) -> (i32, i32) {
    %c1_i32 = arith.constant 1 : i32
    %0 = arith.muli %arg0, %c1_i32 : i32
    %1 = arith.addi %0, %arg1 : i32
    %c0_i32 = arith.constant 0 : i32
    %c0_i32_0 = arith.constant 0 : i32
    return %1, %c0_i32 : i32, i32
  }
  func.func @transform_3(%arg0: i32, %arg1: i32) -> (i32, i32, i32) {
    %c0_i32 = arith.constant 0 : i32
    %c0_i32_0 = arith.constant 0 : i32
    %c0_i32_1 = arith.constant 0 : i32
    return %arg0, %c0_i32, %c0_i32_0 : i32, i32, i32
  }
}

</mosaic_0001>

<bundles_post_ra>
// kernel: tpu_custom_call.1
= control target key start
LH: loop header
LB: loop body
LE: loop exit
PB: predicated region body
PF: predicated region fallthrough
CT: control target
= control target key end

     0   :  { %8 = vsyncpa [#allocation3], 0  ;;  %s236_s0 = inlined_call_operand.vmem [shape: f32[8,128], index: 0, kind: input, shape index: {}]   ;;  %s237_s1 = inlined_call_operand.hbm [shape: f32[8,128], index: 1, kind: input, shape index: {}]   ;;  %s238_s2 = inlined_call_operand.vmem [shape: f32[8,2], index: 2, kind: input, shape index: {}]   ;;  %s239_s3 = inlined_call_operand.hbm [shape: f32[1,1,1], index: 3, kind: output, shape index: {}]  }
   0x1   :  { %9 = vsyncpa [#allocation4], 0  ;;  %s198_s12 = smov [#allocation2]  }
   0x2   :  { %s27_s13 = sshll.u32 %s198_s12, 4  ;;  %s28_s13 = int_to_ptr.vmem [resolvable:$true] %s27_s13 }
   0x3   :  { %s162_s14 = scalar_lea.vmem %s28_s13, 128  ;;  %p167_p1 = scmp.lt.s32.totalorder %s28_s13, %s28_s13 }
   0x4   :  { %p163_p0 = scmp.ne.s32.totalorder %s28_s13, %s162_s14  ;;  %p168_p2 = scmp.lt.s32.totalorder %s162_s14, %s162_s14 }
   0x6   :  { %p169_p3 = por %p168_p2, %p167_p1 }
   0x8   :  { %p170_p4 = pnand %p169_p3, %p163_p0 }
   0xa   :  { %173 = shalt.err (!%p170_p4)
}
   0xb   :  { %30 = dma.hbm_to_vmem [thread:$0]  %s237_s1, 128, %s28_s13, [#allocation3]  }
   0xc   :  { %194 = dma.done.wait [#allocation3], 128  }
   0xd   :  { %195 = vsyncadd [#allocation3], 4294967168  ;;  %vm69_vm0 = vcmask 0   ;;  %v199_v0 = vmov 0.0   ;;  %v71_v1 = vld [vmem:[%s236_s0] sm:$0xff]  ;;  %s200_s19 = smov 127  }
   0xe   :  { %70 = vst.msk [vmem:[#allocation5] sm:$0x1] %vm69_vm0, %v199_v0  ;;  %v72_v2 = vld [vmem:[#allocation2] sm:$0xff]  ;;  %v76_v3 = vmul.f32 %v71_v1, %v71_v1  ;;  %vm102_vm1 = vcmask 7168  }
   0xf   :  { %v73_v4 = vmul.f32 %v72_v2, %v71_v1  ;;  %v79_v5 = vmul.f32 %v72_v2, %v72_v2  ;;  %v93_v16 = vld [vmem:[%s238_s2] sm:$0xff]  ;;  %s201_s2 = smov [#allocation5]  }
  0x10   :  { %77 = vadd.xlane.f32.xlu0 %v76_v3  ;;  %s123_s20 = sshll.u32 %s201_s2, 4  ;;  %s124_s20 = int_to_ptr.vmem [resolvable:$true] %s123_s20 }
  0x11   :  { %74 = vadd.xlane.f32.xlu1 %v73_v4  ;;  %s174_s22 = scalar_lea.vmem %s124_s20, 16  ;;  %s178_s23 = scalar_lea.vmem %s124_s20, 32 }
  0x12   :  { %p175_p5 = scmp.ne.s32.totalorder %s124_s20, %s174_s22  ;;  %p179_p6 = scmp.lt.s32.totalorder %s124_s20, %s124_s20 }
  0x13   :  { %p180_p7 = scmp.lt.s32.totalorder %s178_s23, %s174_s22 }
  0x14   :  { %80 = vadd.xlane.f32.xlu0 %v79_v5 }
  0x15   :  { %v101_v33 = vld [vmem:[#allocation5] sm:$0x1]  ;;  %p181_p8 = por %p180_p7, %p179_p6 }
  0x17   :  { %p182_p9 = pnand %p181_p8, %p175_p5 }
  0x99   :  { %v78_v6 = vpop.xlane.xlu0 %77 }
  0x9a   :  { %150 = vrsqrt.f32 %v78_v6  ;;  %v75_v12 = vpop.xlane.xlu1 %74 }
  0x9d   :  { %v81_v7 = vpop.xlane.xlu0 %80 }
  0x9e   :  { %152 = vrsqrt.f32 %v81_v7 }
  0xa7   :  { %v151_v8 = vpop.eup %150 }
  0xa8   :  { %v83_v10 = vmin.f32 %v151_v8, 1e+08 }
  0xab   :  { %v153_v9 = vpop.eup %152 }
  0xac   :  { %v85_v11 = vmin.f32 %v153_v9, 1e+08 }
  0xae   :  { %v86_v13 = vmul.f32 %v85_v11, %v83_v10 }
  0xb0   :  { %v87_v14 = vmul.f32 %v86_v13, %v75_v12 }
  0xb2   :  { %v88_v15 = vsub.f32 1.0, %v87_v14 }
  0xb4   :  { %v89_v17 = vmul.f32 %v88_v15, %v88_v15  ;;  %v90_v18 = vsub.f32 2.0, %v88_v15 }
  0xb6   :  { %v91_v19 = vmax.f32 %v90_v18, 0.0  ;;  %v94_v20 = vmul.f32 %v93_v16, %v89_v17 }
  0xb8   :  { %v92_v21 = vmul.f32 %v91_v19, %v91_v19 }
  0xba   :  { %v95_v22 = vmul.f32 %v93_v16, %v92_v21 }
  0xbc   :  { %97 = vrot.lane.b32.xlu1 %v95_v22, %s200_s19 }
 0x12e   :  { %v98_v23 = vpop.permute.xlu1 %97 }
 0x12f   :  { %v100_v24 = vadd.f32 %v98_v23, %v94_v20 }
 0x131   :  { %v103_v25 = vsel %vm102_vm1, %v100_v24, 0.0 }
 0x132   :  { %104 = vadd.xlane.f32.xlu0 %v103_v25 }
 0x1bb   :  { %v105_v26 = vpop.xlane.xlu0 %104 }
 0x1bc   :  { %v106_v27 = vrot.slane %v105_v26, 4 }
 0x1be   :  { %v107_v28 = vadd.f32 %v106_v27, %v105_v26 }
 0x1c0   :  { %v108_v29 = vrot.slane %v107_v28, 2 }
 0x1c2   :  { %v109_v30 = vadd.f32 %v108_v29, %v107_v28 }
 0x1c4   :  { %v110_v31 = vrot.slane %v109_v30, 1 }
 0x1c6   :  { %v111_v32 = vadd.f32 %v110_v31, %v109_v30 }
 0x1c8   :  { %144 = vpush %v111_v32 }
 0x1f9   :  { %s145_s21 = spop %144 }
 0x1fa   :  { %v113_v34 = vstv %s145_s21 }
 0x1fb   :  { %v114_v35 = vadd.f32 %v113_v34, %v101_v33 }
 0x1fd   :  { %116 = vst.msk [vmem:[#allocation5] sm:$0x1] %vm69_vm0, %v114_v35 }
 0x1fe   :  { %185 = shalt.err (!%p182_p9)
}
 0x1ff   :  { %126 = dma.vmem_to_hbm [thread:$0]  %s124_s20, 16, %s239_s3, [#allocation4]  }
 0x200   :  { %196 = dma.done.wait [#allocation4], 16  }
 0x201   :  { %197 = vsyncadd [#allocation4], 4294967280 }
 0x202   :  { %130 = vsyncpa [#allocation3], 1 }
 0x203   :  { %131 = vsyncpa [#allocation4], 1 }

</bundles_post_ra>
